<compile_context>
chip_gen: v6e
topology: v6e:2x2x1
jax: 0.10.0
libtpu: 0.0.40
codegen_flags: <defaults>
</compile_context>

<pallas_src>
import functools

import jax
import jax.numpy as jnp
from jax.experimental import pallas as pl
from jax.experimental.pallas import tpu as pltpu


def _round_up(x, m):
    return ((x + m - 1) // m) * m


def _boundary_kernel(p_ref, t_ref, loss_ref, acc_ref, *,
                     img_rows, valid_w, mask_cols, inv_count):
    inner = pl.program_id(1)

    @pl.when(inner == 0)
    def _init():
        acc_ref[...] = jnp.zeros_like(acc_ref)

    p = p_ref[...].astype(jnp.float32)               # (rb, wp)
    t = t_ref[...].astype(jnp.float32)
    rb, wp = p.shape

    # --- vertical taps (sublane rolls + per-image boundary masks) -----------
    # keep_* zero the taps that would cross an image boundary (== conv2d's zero
    # padding) or wrap around the block through the circular roll.
    row = jax.lax.broadcasted_iota(jnp.int32, (rb, 1), 0)
    row_in_img = row % img_rows if img_rows < rb else row
    keep_up = (row_in_img != 0).astype(jnp.float32)                 # (rb, 1)
    keep_dn = (row_in_img != img_rows - 1).astype(jnp.float32)

    up = pltpu.roll(p, shift=1, axis=0) * keep_up                   # p[r-1, :]
    down = pltpu.roll(p, shift=rb - 1, axis=0) * keep_dn            # p[r+1, :]

    sv = up + 2.0 * p + down      # vertical smooth [1, 2, 1]
    dv = up - down                # vertical diff   [1, 0, -1]

    # --- horizontal taps (lane rolls) ----------------------------------------
    if mask_cols:
        # Width not padded: explicitly zero the taps that would wrap around.
        col = jax.lax.broadcasted_iota(jnp.int32, (1, wp), 1)
        keep_l = (col != 0).astype(jnp.float32)                     # (1, wp)
        keep_r = (col != valid_w - 1).astype(jnp.float32)
        left = lambda x: pltpu.roll(x, shift=1, axis=1) * keep_l        # x[:, j-1]
        right = lambda x: pltpu.roll(x, shift=wp - 1, axis=1) * keep_r  # x[:, j+1]
    else:
        # Width was padded with zero columns, so the wrapped / out-of-image
        # taps already read the correct zeros.
        left = lambda x: pltpu.roll(x, shift=1, axis=1)
        right = lambda x: pltpu.roll(x, shift=wp - 1, axis=1)

    g = jnp.abs(left(sv) - right(sv))                     # |grad_x|
    g = g + jnp.abs(left(dv) + 2.0 * dv + right(dv))      # + |grad_y|

    # Padded rows/cols were given target == 1, so (1 - t) already zeroes them.
    contrib = g * (1.0 - t)

    # Per-step lane reduction (XLU) into a tiny (rb, 1) accumulator; the full
    # reduction + mean happens exactly once per outer index, in finalize.
    acc_ref[...] += jnp.sum(contrib, axis=-1, keepdims=True)

    @pl.when(inner == pl.num_programs(1) - 1)
    def _finalize():
        loss_ref[0, 0] = jnp.sum(acc_ref[...]) * inv_count


def boundary_loss(probability_map, target):
    assert probability_map.shape == target.shape
    assert probability_map.ndim == 4 and probability_map.shape[1] == 1, (
        "BoundaryLoss's Sobel conv (1,1,3,3 weight) expects (N, 1, H, W) inputs")
    n, _, h, w = probability_map.shape
    rows = n * h
    wp = _round_up(w, 128)                      # lane-aligned width

    # ---- block sizing --------------------------------------------------------
    # Whole images per block, block rows a multiple of 8, and the f32 working
    # set bounded so double-buffered inputs + temporaries stay comfortably
    # inside scoped VMEM on every generation.
    plane_budget = 1 << 20                                   # ~1 MiB per (rb, wp) f32 plane
    row_budget = max(h, max(8, plane_budget // (4 * wp)))
    imgs_per_block = min(n, max(1, row_budget // h))
    while imgs_per_block > 1 and (imgs_per_block * h) % 8:
        imgs_per_block -= 1
    if (imgs_per_block * h) % 8:
        imgs_per_block = n                                   # fall back to one full block
    num_blocks = pl.cdiv(n, imgs_per_block)
    rb = imgs_per_block * h
    if num_blocks == 1:
        rb = _round_up(rows, 8)                              # full (padded) array block
        # TODO(synk): tile H with a 1-row halo for a single image whose full
        # (h, wp) block would not fit in VMEM.
    rp = num_blocks * rb

    # Split blocks over a leading "parallel" axis so v7x's two TensorCores each
    # reduce half the images into their own partial (no effect on v5e/v6e).
    num_outer = 2 if (num_blocks >= 2 and num_blocks % 2 == 0) else 1
    num_inner = num_blocks // num_outer

    # ---- layout / padding (only when actually needed) ------------------------
    p2 = probability_map.reshape(rows, w)
    t2 = target.reshape(rows, w)
    if (rp, wp) != (rows, w):
        p2 = jnp.pad(p2, ((0, rp - rows), (0, wp - w)))                       # zeros
        t2 = jnp.pad(t2, ((0, rp - rows), (0, wp - w)), constant_values=1.0)  # (1-t)=0

    kernel = functools.partial(
        _boundary_kernel,
        img_rows=h, valid_w=w, mask_cols=(wp == w),
        inv_count=1.0 / float(n * h * w))   # Python scalars only — nothing traced captured

    itemsize = max(p2.dtype.itemsize, t2.dtype.itemsize)
    est = rb * wp * (2 * 2 * itemsize + 10 * 4)   # dbl-buffered inputs + f32 temporaries
    vmem_limit = int(min(max(2 * est, 32 << 20), 56 << 20))

    partials = pl.pallas_call(
        kernel,
        out_shape=jax.ShapeDtypeStruct((num_outer, 1), jnp.float32),
        grid_spec=pltpu.PrefetchScalarGridSpec(
            num_scalar_prefetch=0,
            grid=(num_outer, num_inner),
            in_specs=[
                pl.BlockSpec((rb, wp), lambda o, i: (o * num_inner + i, 0)),
                pl.BlockSpec((rb, wp), lambda o, i: (o * num_inner + i, 0)),
            ],
            out_specs=pl.BlockSpec((1, 1), lambda o, i: (o, 0),
                                   memory_space=pltpu.SMEM),
            scratch_shapes=[pltpu.VMEM((rb, 1), jnp.float32)],
        ),
        compiler_params=pltpu.CompilerParams(
            dimension_semantics=("parallel", "arbitrary"),
            vmem_limit_bytes=vmem_limit),
    )(p2, t2)

    return jnp.sum(partials)


def _reference_boundary_loss(p, t):
    """Plain-JAX reference (cross-correlation, zero padding, like F.conv2d)."""
    kx = [[1.0, 0.0, -1.0], [2.0, 0.0, -2.0], [1.0, 0.0, -1.0]]
    ky = [[1.0, 2.0, 1.0], [0.0, 0.0, 0.0], [-1.0, -2.0, -1.0]]
    h, w = p.shape[2], p.shape[3]
    pp = jnp.pad(p, ((0, 0), (0, 0), (1, 1), (1, 1)))
    gx = jnp.zeros_like(p)
    gy = jnp.zeros_like(p)
    for a in range(3):
        for b in range(3):
            win = pp[:, :, a:a + h, b:b + w]
            gx = gx + kx[a][b] * win
            gy = gy + ky[a][b] * win
    return jnp.mean((jnp.abs(gx) + jnp.abs(gy)) * (1.0 - t))


if __name__ == "__main__":
    key = jax.random.PRNGKey(0)
    k1, k2 = jax.random.split(key)
    # NCHW single-channel probability map + binary-ish target (C must be 1 for
    # the (1,1,3,3) Sobel conv in the reference module).
    prob = jax.nn.sigmoid(jax.random.normal(k1, (2, 1, 16, 16), jnp.float32))
    target = (jax.random.uniform(k2, (2, 1, 16, 16)) > 0.5).astype(jnp.float32)

    loss = boundary_loss(prob, target)
    jax.block_until_ready(loss)

    ref = _reference_boundary_loss(prob, target)
    # All-f32 VPU stencil (no MXU multipass): tight tolerance.
    assert jnp.allclose(loss, ref, rtol=1e-4, atol=1e-6), (loss, ref)
    print("KERNEL_OK")
</pallas_src>

<mosaic_0001>
module attributes {stable_mosaic.version = 11 : i64} {
  func.func @_boundary_kernel(%arg0: i32, %arg1: i32, %arg2: memref<32x128xf32, #tpu.memory_space<vmem>>, %arg3: memref<32x128xf32, #tpu.memory_space<vmem>>, %arg4: memref<1x1xf32, #tpu.memory_space<smem>>, %arg5: memref<32x1xf32, #tpu.memory_space<vmem>>) attributes {dimension_semantics = [#tpu.dimension_semantics<parallel>, #tpu.dimension_semantics<arbitrary>], iteration_bounds = array<i64: 1, 1>, scalar_prefetch = 0 : i64, scratch_operands = 1 : i64, tpu.core_type = #tpu.core_type<tc>, window_params = [{transform_indices = @transform_0, window_bounds = array<i64: 32, 128>}, {transform_indices = @transform_1, window_bounds = array<i64: 32, 128>}, {transform_indices = @transform_2, window_bounds = array<i64: 1, 1>}]} {
    %c0_i32 = arith.constant 0 : i32
    %0 = arith.cmpi eq, %arg1, %c0_i32 : i32
    %1 = arith.extui %0 : i1 to i32
    %c0_i32_0 = arith.constant 0 : i32
    %2 = arith.cmpi ne, %1, %c0_i32_0 : i32
    scf.if %2 {
      %cst_22 = arith.constant 0.000000e+00 : f32
      %64 = vector.broadcast %cst_22 : f32 to vector<32x1xf32>
      %c0_23 = arith.constant 0 : index
      %c0_24 = arith.constant 0 : index
      %65 = vector.load %arg5[%c0_23, %c0_24] : memref<32x1xf32, #tpu.memory_space<vmem>>, vector<32x1xf32>
      tpu.vector_store %arg5[%c0_23, %c0_24], %64 {strides = array<i32>} : memref<32x1xf32, #tpu.memory_space<vmem>>, vector<32x1xf32>,
    } else {
    }
    %c0 = arith.constant 0 : index
    %c0_1 = arith.constant 0 : index
    %3 = vector.load %arg2[%c0, %c0_1] : memref<32x128xf32, #tpu.memory_space<vmem>>, vector<32x128xf32>
    %c0_2 = arith.constant 0 : index
    %c0_3 = arith.constant 0 : index
    %4 = vector.load %arg3[%c0_2, %c0_3] : memref<32x128xf32, #tpu.memory_space<vmem>>, vector<32x128xf32>
    %5 = tpu.iota {dimensions = array<i32: 0>} : vector<32x1xi32>
    %c16_i32 = arith.constant 16 : i32
    %c0_i32_4 = arith.constant 0 : i32
    %6 = arith.cmpi eq, %c16_i32, %c0_i32_4 : i32
    %c1_i32 = arith.constant 1 : i32
    %7 = arith.select %6, %c1_i32, %c16_i32 : i32
    %8 = vector.broadcast %7 : i32 to vector<32x1xi32>
    %9 = arith.remsi %5, %8 : vector<32x1xi32>
    %c0_i32_5 = arith.constant 0 : i32
    %10 = vector.broadcast %c0_i32_5 : i32 to vector<32x1xi32>
    %11 = arith.cmpi ne, %9, %10 : vector<32x1xi32>
    %c0_i32_6 = arith.constant 0 : i32
    %12 = vector.broadcast %c0_i32_6 : i32 to vector<32x1xi32>
    %13 = arith.cmpi slt, %9, %12 : vector<32x1xi32>
    %c0_i32_7 = arith.constant 0 : i32
    %14 = arith.cmpi slt, %7, %c0_i32_7 : i32
    %15 = vector.broadcast %14 : i1 to vector<32x1xi1>
    %16 = vector.broadcast %15 : vector<32x1xi1> to vector<32x1xi1>
    %17 = arith.xori %13, %16 : vector<32x1xi1>
    %18 = arith.andi %17, %11 : vector<32x1xi1>
    %19 = vector.broadcast %7 : i32 to vector<32x1xi32>
    %20 = arith.addi %9, %19 : vector<32x1xi32>
    %21 = arith.select %18, %20, %9 : vector<32x1xi1>, vector<32x1xi32>
    %c0_i32_8 = arith.constant 0 : i32
    %22 = vector.broadcast %c0_i32_8 : i32 to vector<32x1xi32>
    %23 = arith.cmpi ne, %21, %22 : vector<32x1xi32>
    %24 = arith.extui %23 : vector<32x1xi1> to vector<32x1xi32>
    %25 = arith.sitofp %24 : vector<32x1xi32> to vector<32x1xf32>
    %c15_i32 = arith.constant 15 : i32
    %26 = vector.broadcast %c15_i32 : i32 to vector<32x1xi32>
    %27 = arith.cmpi ne, %21, %26 : vector<32x1xi32>
    %28 = arith.extui %27 : vector<32x1xi1> to vector<32x1xi32>
    %29 = arith.sitofp %28 : vector<32x1xi32> to vector<32x1xf32>
    %c1_i32_9 = arith.constant 1 : i32
    %30 = tpu.dynamic_rotate %3 by %c1_i32_9 dim 0 : vector<32x128xf32>, i32 -> vector<32x128xf32>
    %31 = vector.broadcast %25 : vector<32x1xf32> to vector<32x128xf32>
    %32 = arith.mulf %30, %31 : vector<32x128xf32>
    %c31_i32 = arith.constant 31 : i32
    %33 = tpu.dynamic_rotate %3 by %c31_i32 dim 0 : vector<32x128xf32>, i32 -> vector<32x128xf32>
    %34 = vector.broadcast %29 : vector<32x1xf32> to vector<32x128xf32>
    %35 = arith.mulf %33, %34 : vector<32x128xf32>
    %cst = arith.constant 2.000000e+00 : f32
    %36 = vector.broadcast %cst : f32 to vector<32x128xf32>
    %37 = arith.mulf %36, %3 : vector<32x128xf32>
    %38 = arith.addf %32, %37 : vector<32x128xf32>
    %39 = arith.addf %38, %35 : vector<32x128xf32>
    %40 = arith.subf %32, %35 : vector<32x128xf32>
    %c1_i32_10 = arith.constant 1 : i32
    %41 = tpu.dynamic_rotate %39 by %c1_i32_10 dim 1 : vector<32x128xf32>, i32 -> vector<32x128xf32>
    %c127_i32 = arith.constant 127 : i32
    %42 = tpu.dynamic_rotate %39 by %c127_i32 dim 1 : vector<32x128xf32>, i32 -> vector<32x128xf32>
    %43 = arith.subf %41, %42 : vector<32x128xf32>
    %44 = math.absf %43 : vector<32x128xf32>
    %c1_i32_11 = arith.constant 1 : i32
    %45 = tpu.dynamic_rotate %40 by %c1_i32_11 dim 1 : vector<32x128xf32>, i32 -> vector<32x128xf32>
    %cst_12 = arith.constant 2.000000e+00 : f32
    %46 = vector.broadcast %cst_12 : f32 to vector<32x128xf32>
    %47 = arith.mulf %46, %40 : vector<32x128xf32>
    %48 = arith.addf %45, %47 : vector<32x128xf32>
    %c127_i32_13 = arith.constant 127 : i32
    %49 = tpu.dynamic_rotate %40 by %c127_i32_13 dim 1 : vector<32x128xf32>, i32 -> vector<32x128xf32>
    %50 = arith.addf %48, %49 : vector<32x128xf32>
    %51 = math.absf %50 : vector<32x128xf32>
    %52 = arith.addf %44, %51 : vector<32x128xf32>
    %cst_14 = arith.constant 1.000000e+00 : f32
    %53 = vector.broadcast %cst_14 : f32 to vector<32x128xf32>
    %54 = arith.subf %53, %4 : vector<32x128xf32>
    %55 = arith.mulf %52, %54 : vector<32x128xf32>
    %c0_15 = arith.constant 0 : index
    %c0_16 = arith.constant 0 : index
    %56 = vector.load %arg5[%c0_15, %c0_16] : memref<32x1xf32, #tpu.memory_space<vmem>>, vector<32x1xf32>
    %cst_17 = arith.constant dense<0.000000e+00> : vector<32xf32>
    %57 = vector.multi_reduction <add>, %55, %cst_17 [1] : vector<32x128xf32> to vector<32xf32>
    %58 = vector.shape_cast %57 : vector<32xf32> to vector<32x1xf32>
    %59 = arith.addf %56, %58 : vector<32x1xf32>
    %c0_18 = arith.constant 0 : index
    %c0_19 = arith.constant 0 : index
    %60 = vector.load %arg5[%c0_18, %c0_19] : memref<32x1xf32, #tpu.memory_space<vmem>>, vector<32x1xf32>
    tpu.vector_store %arg5[%c0_18, %c0_19], %59 {strides = array<i32>} : memref<32x1xf32, #tpu.memory_space<vmem>>, vector<32x1xf32>,
    %c0_i32_20 = arith.constant 0 : i32
    %61 = arith.cmpi eq, %arg1, %c0_i32_20 : i32
    %62 = arith.extui %61 : i1 to i32
    %c0_i32_21 = arith.constant 0 : i32
    %63 = arith.cmpi ne, %62, %c0_i32_21 : i32
    scf.if %63 {
      %c0_22 = arith.constant 0 : index
      %c0_23 = arith.constant 0 : index
      %64 = vector.load %arg5[%c0_22, %c0_23] : memref<32x1xf32, #tpu.memory_space<vmem>>, vector<32x1xf32>
      %65 = vector.shape_cast %64 : vector<32x1xf32> to vector<1x32x1xf32>
      %cst_24 = arith.constant dense<0.000000e+00> : vector<1xf32>
      %66 = vector.multi_reduction <add>, %65, %cst_24 [1, 2] : vector<1x32x1xf32> to vector<1xf32>
      %67 = vector.shape_cast %66 : vector<1xf32> to vector<1x1x1xf32>
      %68 = vector.extract %67[0, 0, 0] : f32 from vector<1x1x1xf32>
      %cst_25 = arith.constant 0.001953125 : f32
      %69 = arith.mulf %68, %cst_25 : f32
      %c0_26 = arith.constant 0 : index
      %c0_27 = arith.constant 0 : index
      %70 = memref.load %arg4[%c0_26, %c0_27] : memref<1x1xf32, #tpu.memory_space<smem>>
      memref.store %69, %arg4[%c0_26, %c0_27] : memref<1x1xf32, #tpu.memory_space<smem>>
    } else {
    }
    return
  }
  func.func @transform_0(%arg0: i32, %arg1: i32) -> (i32, i32) {
    %c1_i32 = arith.constant 1 : i32
    %0 = arith.muli %arg0, %c1_i32 : i32
    %1 = arith.addi %0, %arg1 : i32
    %c0_i32 = arith.constant 0 : i32
    %c0_i32_0 = arith.constant 0 : i32
    return %1, %c0_i32 : i32, i32
  }
  func.func @transform_1(%arg0: i32, %arg1: i32) -> (i32, i32) {
    %c1_i32 = arith.constant 1 : i32
    %0 = arith.muli %arg0, %c1_i32 : i32
    %1 = arith.addi %0, %arg1 : i32
    %c0_i32 = arith.constant 0 : i32
    %c0_i32_0 = arith.constant 0 : i32
    return %1, %c0_i32 : i32, i32
  }
  func.func @transform_2(%arg0: i32, %arg1: i32) -> (i32, i32) {
    %c0_i32 = arith.constant 0 : i32
    %c0_i32_0 = arith.constant 0 : i32
    return %arg0, %c0_i32 : i32, i32
  }
}

</mosaic_0001>

<bundles_post_ra>
// kernel: tpu_custom_call.1
= control target key start
LH: loop header
LB: loop body
LE: loop exit
PB: predicated region body
PF: predicated region fallthrough
CT: control target
= control target key end

     0   :  { %7 = vsyncpa [#allocation4], 0  ;;  %s478_s0 = inlined_call_operand.hbm [shape: f32[32,128], index: 0, kind: input, shape index: {}]   ;;  %s479_s1 = inlined_call_operand.hbm [shape: f32[32,128], index: 1, kind: input, shape index: {}]   ;;  %s480_s2 = inlined_call_operand.hbm [shape: f32[1,1], index: 2, kind: output, shape index: {}]  }
   0x1   :  { %8 = vsyncpa [#allocation7], 0 }
   0x2   :  { %9 = vsyncpa [#allocation5], 0  ;;  %s386_s9 = smov [#allocation3]  }
   0x3   :  { %s19_s10 = sshll.u32 %s386_s9, 4  ;;  %s20_s10 = int_to_ptr.vmem [resolvable:$true] %s19_s10 }
   0x4   :  { %s340_s11 = scalar_lea.vmem %s20_s10, 512  ;;  %p345_p1 = scmp.lt.s32.totalorder %s20_s10, %s20_s10 }
   0x5   :  { %p341_p0 = scmp.ne.s32.totalorder %s20_s10, %s340_s11  ;;  %p346_p2 = scmp.lt.s32.totalorder %s340_s11, %s340_s11 }
   0x7   :  { %p347_p3 = por %p346_p2, %p345_p1 }
   0x9   :  { %p348_p4 = pnand %p347_p3, %p341_p0 }
   0xb   :  { %351 = shalt.err (!%p348_p4)
}
   0xc   :  { %s387_s12 = smov 128   ;;  %s388_s13 = smov 8  }
   0xd   :  { %25 = dma.hbm_to_vmem [thread:$0]  %s478_s0, 512, %s20_s10, [#allocation4], %s387_s12, %s387_s12, %s388_s13  }
   0xe   :  { %s389_s16 = smov [#allocation6]  }
   0xf   :  { %s35_s17 = sshll.u32 %s389_s16, 4  ;;  %s36_s17 = int_to_ptr.vmem [resolvable:$true] %s35_s17 }
  0x10   :  { %s360_s18 = scalar_lea.vmem %s36_s17, 512  ;;  %p365_p6 = scmp.lt.s32.totalorder %s36_s17, %s36_s17 }
  0x11   :  { %p361_p5 = scmp.ne.s32.totalorder %s36_s17, %s360_s18  ;;  %p366_p7 = scmp.lt.s32.totalorder %s360_s18, %s360_s18 }
  0x13   :  { %p367_p8 = por %p366_p7, %p365_p6 }
  0x15   :  { %p368_p9 = pnand %p367_p8, %p361_p5 }
  0x17   :  { %371 = shalt.err (!%p368_p9)
}
  0x18   :  { %41 = dma.hbm_to_vmem [thread:$0]  %s479_s1, 512, %s36_s17, [#allocation7], %s387_s12, %s387_s12, %s388_s13  }
  0x19   :  { %380 = dma.done.wait [#allocation4], 512  }
  0x1a   :  { %381 = vsyncadd [#allocation4], 4294966784 }
  0x1b   :  { %382 = dma.done.wait [#allocation7], 512  }
  0x1c   :  { %383 = vsyncadd [#allocation7], 4294966784  ;;  %v69_v0 = vlaneseq  ;;  %v61_v6 = vld [vmem:[#allocation3] sm:$0xff]  ;;  %v62_v7 = vld [vmem:[#allocation3 + $0x8] sm:$0xff]  ;;  %v390_v9 = vmov 0.0   ;;  %s391_s0 = smov 1  }
  0x1d   :  { %v64_v8 = vld [vmem:[#allocation3 + $0x18] sm:$0xff]  ;;  %v146_v12 = vrot.slane %v61_v6, 7  ;;  %v159_v14 = vrot.slane %v61_v6, 1  ;;  %v160_v15 = vrot.slane %v62_v7, 1  ;;  %v63_v16 = vld [vmem:[#allocation3 + $0x10] sm:$0xff]  ;;  %v147_v17 = vrot.slane %v62_v7, 7 }
  0x1e   :  { %v415_v1 = vshrl.u32 %v69_v0, 7  ;;  %v149_v13 = vrot.slane %v64_v8, 7  ;;  %v161_v18 = vrot.slane %v63_v16, 1  ;;  %v173_v19 = vmul.f32 2.0, %v62_v7  ;;  %s392_s1 = smov 127   ;;  %s393_s23 = smov [#allocation8]  }
  0x1f   :  { %v148_v29 = vrot.slane %v63_v16, 7  ;;  %v162_v30 = vrot.slane %v64_v8, 1  ;;  %v172_v38 = vmul.f32 2.0, %v61_v6  ;;  %v174_v42 = vmul.f32 2.0, %v63_v16 }
  0x20   :  { %v78_v2 = vand.u32 15, %v415_v1  ;;  %v71_v3 = vadd.s32 8, %v415_v1  ;;  %v72_v4 = vadd.s32 16, %v415_v1  ;;  %vm150_vm1 = vcmp.lt.s32.totalorder %v415_v1, 1 }
  0x21   :  { %vm163_vm2 = vcmp.lt.s32.totalorder %v415_v1, 7  ;;  %v154_v20 = vsel %vm150_vm1, %v149_v13, %v146_v12  ;;  %v153_v24 = vsel %vm150_vm1, %v146_v12, %v147_v17  ;;  %v152_v33 = vsel %vm150_vm1, %v147_v17, %v148_v29 }
  0x22   :  { %vm122_vm0 = vcmp.ne.s32.totalorder %v78_v2, 0  ;;  %v85_v5 = vand.u32 15, %v71_v3  ;;  %v92_v11 = vand.u32 15, %v72_v4  ;;  %v166_v21 = vsel %vm163_vm2, %v159_v14, %v160_v15 }
  0x23   :  { %v318_v10 = vsel %vm122_vm0, 1.0, %v390_v9  ;;  %v165_v25 = vsel %vm163_vm2, %v160_v15, %v161_v18  ;;  %v177_v28 = vadd.f32 %v173_v19, %v153_v24  ;;  %v73_v34 = vadd.s32 24, %v415_v1  ;;  %v66_v1 = vld [vmem:[#allocation6 + $0x8] sm:$0xff] }
  0x24   :  { %vm135_vm3 = vcmp.ne.s32.totalorder %v85_v5, 15  ;;  %vm124_vm4 = vcmp.ne.s32.totalorder %v92_v11, 0  ;;  %v155_v23 = vmul.f32 %v318_v10, %v154_v20  ;;  %v164_v37 = vsel %vm163_vm2, %v161_v18, %v162_v30  ;;  %v65_v10 = vld [vmem:[#allocation6] sm:$0xff] }
  0x25   :  { %v320_v22 = vsel %vm135_vm3, 1.0, %v390_v9  ;;  %v319_v26 = vsel %vm124_vm4, 1.0, %v390_v9  ;;  %v99_v39 = vand.u32 15, %v73_v34  ;;  %v167_v46 = vsel %vm163_vm2, %v162_v30, %v159_v14 }
  0x26   :  { %v169_v27 = vmul.f32 %v320_v22, %v165_v25  ;;  %v184_v31 = vsub.f32 %v155_v23, %v166_v21  ;;  %v157_v36 = vmul.f32 %v319_v26, %v152_v33  ;;  %v176_v41 = vadd.f32 %v172_v38, %v155_v23  ;;  %v68_v38 = vld [vmem:[#allocation6 + $0x18] sm:$0xff] }
  0x27   :  { %vm137_vm5 = vcmp.ne.s32.totalorder %v99_v39, 15  ;;  %v175_v49 = vmul.f32 2.0, %v64_v8  ;;  %v151_v50 = vsel %vm150_vm1, %v148_v29, %v149_v13  ;;  %vm56_vm6 = vcmask 7168  }
  0x28   :  { %v181_v32 = vadd.f32 %v177_v28, %v169_v27  ;;  %212 = vrot.lane.b32.xlu0 %v184_v31, %s391_s0  ;;  %v185_v35 = vsub.f32 %v153_v24, %v169_v27  ;;  %v186_v40 = vsub.f32 %v157_v36, %v164_v37  ;;  %v180_v43 = vadd.f32 %v176_v41, %v166_v21  ;;  %v67_v27 = vld [vmem:[#allocation6 + $0x10] sm:$0xff] }
  0x29   :  { %v178_v44 = vadd.f32 %v174_v42, %v157_v36  ;;  %v321_v45 = vsel %vm137_vm5, 1.0, %v390_v9  ;;  %v179_v52 = vadd.f32 %v175_v49, %v151_v50  ;;  %58 = vst.msk [vmem:[#allocation2 + $0x8] sm:$0xff] %vm56_vm6, %v390_v9  ;;  %57 = vst.msk [vmem:[#allocation2] sm:$0xff] %vm56_vm6, %v390_v9  ;;  %v220_v60 = vmul.f32 2.0, %v184_v31 }
  0x2a   :  { %190 = vrot.lane.b32.xlu1 %v181_v32, %s391_s0  ;;  %v171_v48 = vmul.f32 %v321_v45, %v167_v46  ;;  %59 = vst.msk [vmem:[#allocation2 + $0x10] sm:$0xff] %vm56_vm6, %v390_v9  ;;  %60 = vst.msk [vmem:[#allocation2 + $0x18] sm:$0xff] %vm56_vm6, %v390_v9  ;;  %v221_v58 = vmul.f32 2.0, %v185_v35  ;;  %v249_v8 = vsub.f32 1.0, %v66_v1  ;;  %v222_v14 = vmul.f32 2.0, %v186_v40 }
  0x2b   :  { %v182_v47 = vadd.f32 %v178_v44, %v164_v37  ;;  %v248_v18 = vsub.f32 1.0, %v65_v10 }
  0x2c   :  { %214 = vrot.lane.b32.xlu0 %v185_v35, %s391_s0  ;;  %v187_v51 = vsub.f32 %v151_v50, %v171_v48  ;;  %v183_v53 = vadd.f32 %v179_v52, %v171_v48 }
  0x2e   :  { %198 = vrot.lane.b32.xlu1 %v181_v32, %s392_s1  ;;  %v223_v25 = vmul.f32 2.0, %v187_v51  ;;  %v250_v32 = vsub.f32 1.0, %v67_v27 }
  0x30   :  { %216 = vrot.lane.b32.xlu0 %v186_v40, %s391_s0  ;;  %v257_v46 = vld [vmem:[#allocation2 + $0x8] sm:$0xff]  ;;  %v256_v49 = vld [vmem:[#allocation2] sm:$0xff] }
  0x31   :  { %v258_v52 = vld [vmem:[#allocation2 + $0x10] sm:$0xff] }
  0x32   :  { %228 = vrot.lane.b32.xlu1 %v184_v31, %s392_s1 }
  0x34   :  { %230 = vrot.lane.b32.xlu0 %v185_v35, %s392_s1 }
  0x36   :  { %188 = vrot.lane.b32.xlu1 %v180_v43, %s391_s0 }
  0x38   :  { %196 = vrot.lane.b32.xlu0 %v180_v43, %s392_s1  ;;  %v251_v43 = vsub.f32 1.0, %v68_v38 }
  0x3a   :  { %192 = vrot.lane.b32.xlu1 %v182_v47, %s391_s0 }
  0x3c   :  { %200 = vrot.lane.b32.xlu0 %v182_v47, %s392_s1 }
  0x3e   :  { %218 = vrot.lane.b32.xlu1 %v187_v51, %s391_s0 }
  0x40   :  { %232 = vrot.lane.b32.xlu0 %v186_v40, %s392_s1 }
  0x42   :  { %194 = vrot.lane.b32.xlu1 %v183_v53, %s391_s0 }
  0x44   :  { %202 = vrot.lane.b32.xlu0 %v183_v53, %s392_s1 }
  0x46   :  { %234 = vrot.lane.b32.xlu1 %v187_v51, %s392_s1 }
  0x9a   :  { %v213_v54 = vpop.permute.xlu0 %212 }
  0x9b   :  { %v224_v2 = vadd.f32 %v220_v60, %v213_v54 }
  0x9c   :  { %v191_v55 = vpop.permute.xlu1 %190 }
  0x9e   :  { %v215_v56 = vpop.permute.xlu0 %214 }
  0x9f   :  { %v225_v62 = vadd.f32 %v221_v58, %v215_v56 }
  0xa0   :  { %v199_v57 = vpop.permute.xlu1 %198 }
  0xa1   :  { %v205_v63 = vsub.f32 %v191_v55, %v199_v57  ;;  %v259_v55 = vld [vmem:[#allocation2 + $0x18] sm:$0xff] }
  0xa2   :  { %v217_v59 = vpop.permute.xlu0 %216 }
  0xa3   :  { %v209_v5 = vand.u32 2147483647, %v205_v63  ;;  %v226_v22 = vadd.f32 %v222_v14, %v217_v59 }
  0xa4   :  { %v229_v61 = vpop.permute.xlu1 %228 }
  0xa5   :  { %v236_v6 = vadd.f32 %v229_v61, %v224_v2 }
  0xa6   :  { %v231_v0 = vpop.permute.xlu0 %230 }
  0xa7   :  { %v237_v3 = vadd.f32 %v231_v0, %v225_v62  ;;  %v240_v15 = vand.u32 2147483647, %v236_v6 }
  0xa8   :  { %v189_v4 = vpop.permute.xlu1 %188 }
  0xa9   :  { %v241_v7 = vand.u32 2147483647, %v237_v3 }
  0xaa   :  { %v197_v9 = vpop.permute.xlu0 %196 }
  0xab   :  { %v245_v11 = vadd.f32 %v241_v7, %v209_v5  ;;  %v204_v12 = vsub.f32 %v189_v4, %v197_v9 }
  0xac   :  { %v193_v13 = vpop.permute.xlu1 %192 }
  0xad   :  { %v208_v16 = vand.u32 2147483647, %v204_v12  ;;  %v253_v17 = vmul.f32 %v249_v8, %v245_v11 }
  0xae   :  { %v201_v19 = vpop.permute.xlu0 %200 }
  0xaf   :  { %v244_v20 = vadd.f32 %v240_v15, %v208_v16  ;;  %262 = vadd.xlane.f32.xlu1 %v253_v17  ;;  %v206_v23 = vsub.f32 %v193_v13, %v201_v19 }
  0xb0   :  { %v219_v21 = vpop.permute.xlu1 %218 }
  0xb1   :  { %v252_v24 = vmul.f32 %v248_v18, %v244_v20  ;;  %v210_v30 = vand.u32 2147483647, %v206_v23  ;;  %v227_v33 = vadd.f32 %v223_v25, %v219_v21 }
  0xb2   :  { %v233_v26 = vpop.permute.xlu0 %232 }
  0xb3   :  { %v238_v28 = vadd.f32 %v233_v26, %v226_v22  ;;  %260 = vadd.xlane.f32.xlu0 %v252_v24 }
  0xb4   :  { %v195_v29 = vpop.permute.xlu1 %194 }
  0xb5   :  { %v242_v31 = vand.u32 2147483647, %v238_v28 }
  0xb6   :  { %v203_v34 = vpop.permute.xlu0 %202 }
  0xb7   :  { %v246_v35 = vadd.f32 %v242_v31, %v210_v30  ;;  %v207_v36 = vsub.f32 %v195_v29, %v203_v34 }
  0xb8   :  { %v235_v37 = vpop.permute.xlu1 %234 }
  0xb9   :  { %v239_v39 = vadd.f32 %v235_v37, %v227_v33  ;;  %v211_v40 = vand.u32 2147483647, %v207_v36  ;;  %v254_v41 = vmul.f32 %v250_v32, %v246_v35 }
  0xbb   :  { %v243_v42 = vand.u32 2147483647, %v239_v39  ;;  %264 = vadd.xlane.f32.xlu0 %v254_v41 }
  0xbd   :  { %v247_v44 = vadd.f32 %v243_v42, %v211_v40 }
  0xbf   :  { %v255_v45 = vmul.f32 %v251_v43, %v247_v44 }
  0xc1   :  { %266 = vadd.xlane.f32.xlu0 %v255_v45 }
 0x138   :  { %v263_v47 = vpop.xlane.xlu1 %262 }
 0x139   :  { %v269_v48 = vadd.f32 %v263_v47, %v257_v46 }
 0x13b   :  { %274 = vst.msk [vmem:[#allocation2 + $0x8] sm:$0xff] %vm56_vm6, %v269_v48 }
 0x13c   :  { %v261_v50 = vpop.xlane.xlu0 %260 }
 0x13d   :  { %v268_v51 = vadd.f32 %v261_v50, %v256_v49 }
 0x13f   :  { %273 = vst.msk [vmem:[#allocation2] sm:$0xff] %vm56_vm6, %v268_v51 }
 0x142   :  { %v281_v59 = vld [vmem:[#allocation2 + $0x8] sm:$0xff] }
 0x143   :  { %v285_v62 = vsel %vm56_vm6, %v281_v59, 0.0 }
 0x144   :  { %v265_v53 = vpop.xlane.xlu0 %264 }
 0x145   :  { %v270_v54 = vadd.f32 %v265_v53, %v258_v52 }
 0x146   :  { %v280_v58 = vld [vmem:[#allocation2] sm:$0xff] }
 0x147   :  { %275 = vst.msk [vmem:[#allocation2 + $0x10] sm:$0xff] %vm56_vm6, %v270_v54  ;;  %v284_v61 = vsel %vm56_vm6, %v280_v58, 0.0 }
 0x148   :  { %v286_v0 = vadd.f32 %v285_v62, %v284_v61 }
 0x14a   :  { %v267_v56 = vpop.xlane.xlu0 %266 }
 0x14b   :  { %v271_v57 = vadd.f32 %v267_v56, %v259_v55 }
 0x14d   :  { %276 = vst.msk [vmem:[#allocation2 + $0x18] sm:$0xff] %vm56_vm6, %v271_v57 }
 0x14e   :  { %v282_v60 = vld [vmem:[#allocation2 + $0x10] sm:$0xff] }
 0x14f   :  { %v287_v63 = vsel %vm56_vm6, %v282_v60, 0.0 }
 0x150   :  { %v288_v2 = vadd.f32 %v287_v63, %v286_v0 }
 0x154   :  { %v283_v1 = vld [vmem:[#allocation2 + $0x18] sm:$0xff] }
 0x155   :  { %v289_v3 = vsel %vm56_vm6, %v283_v1, 0.0 }
 0x156   :  { %v290_v4 = vadd.f32 %v289_v3, %v288_v2 }
 0x158   :  { %291 = vadd.xlane.f32.xlu1 %v290_v4 }
 0x1e1   :  { %v292_v5 = vpop.xlane.xlu1 %291 }
 0x1e2   :  { %v293_v6 = vrot.slane %v292_v5, 4 }
 0x1e4   :  { %v294_v7 = vadd.f32 %v293_v6, %v292_v5 }
 0x1e6   :  { %v295_v8 = vrot.slane %v294_v7, 2 }
 0x1e8   :  { %v296_v9 = vadd.f32 %v295_v8, %v294_v7 }
 0x1ea   :  { %v297_v10 = vrot.slane %v296_v9, 1 }
 0x1ec   :  { %v298_v11 = vadd.f32 %v297_v10, %v296_v9 }
 0x1ee   :  { %322 = vpush %v298_v11 }
 0x21f   :  { %s323_s21 = spop %322 }
 0x220   :  { %s300_s22 = smul.f32 0.001953125, %s323_s21 }
 0x222   :  { %302 = sst [smem:[#allocation8]] %s300_s22 }
 0x223   :  { %310 = dma.smem_to_hbm %s393_s23, 16, %s480_s2, [#allocation5]  }
 0x224   :  { %384 = dma.done.wait [#allocation5], 16  }
 0x225   :  { %385 = vsyncadd [#allocation5], 4294967280 }
 0x226   :  { %314 = sfence }
 0x227   :  { %315 = vsyncpa [#allocation4], 1 }
 0x228   :  { %316 = vsyncpa [#allocation7], 1 }
 0x229   :  { %317 = vsyncpa [#allocation5], 1 }

</bundles_post_ra>
